<compile_context>
chip_gen: v6e
topology: v6e:2x2x1
jax: 0.10.0
libtpu: 0.0.40
codegen_flags: <defaults>
</compile_context>

<pallas_src>
import jax
import jax.numpy as jnp
from jax import lax
from jax.experimental import pallas as pl
from jax.experimental.pallas import tpu as pltpu  # noqa: F401  (imported for completeness)


def entnet_kernel(keys_ref, sent_ref, wk_ref, wv_ref, wc_ref,
                  ents_out_ref, joint_out_ref):
    T, B, D = sent_ref.shape
    E = keys_ref.shape[1]
    f32 = jnp.float32

    # ---------- one-time pre-loop work (all precompute folded into the kernel) ----------
    keys = keys_ref[...]          # (B, E, D)
    sent = sent_ref[...]          # (T, B, D)
    wk = wk_ref[...]              # (D, D)  nn.Linear layout (out, in): y = x @ W.T
    wv = wv_ref[...]
    wc = wc_ref[...]

    # Batched contract-last matmuls ('xyd,xzd->xyz'): no transposes, no reshapes.
    # Broadcasts hoisted once (JAX does not CSE broadcast_in_dim inside loops).
    # NOTE: matmuls use default precision; pass precision=lax.Precision.HIGHEST
    # here if bit-level parity with the fp32 PyTorch reference is required.
    wk_b = jnp.broadcast_to(wk[None], (B, D, D))
    wv_b = jnp.broadcast_to(wv[None], (B, D, D))
    wc_t = jnp.broadcast_to(wc[None], (T, D, D))

    # Loop-invariant:  ok = keys @ Wk^T.   All steps at once:  oc = sent @ Wc^T.
    ok = jnp.einsum('bed,bfd->bef', keys, wk_b, preferred_element_type=f32)      # (B, E, D)
    oc_all = jnp.einsum('tbd,tfd->tbf', sent, wc_t, preferred_element_type=f32)  # (T, B, D)

    # Entities initialized from the same key embeddings (key_init on same ids).
    # Lazy L2 norm carry: actual entities == s * v with s = 1/||v_row||_2.
    v = keys
    s = jnp.ones((B, E, 1), f32)
    dist = jnp.zeros((B, E), f32)

    # T is tiny: a static Python loop == full unroll (straight-line code, full LLO
    # scheduling visibility, static slices of oc_all / sent).
    # TODO(synk): for large T switch to lax.fori_loop with a bounded unroll and stage
    # oc_all through VMEM scratch so the per-step index stays a ref index.
    for t in range(T):
        h = sent[t]               # (B, D)   static slice
        oc = oc_all[t]            # (B, D)

        # ---- DoubleDotAttention (act='sigmoid') ----
        #   act = sum_D(keys*h) + sum_D(entities*h) == sum_D((keys + entities)*h)
        # fused into a single lane reduce; entities == s * v (lazy norm applied here).
        e_scaled = s * v                                              # (B, E, D)
        act = jnp.sum((keys + e_scaled) * h[:, None, :], axis=2)      # (B, E)
        dist = jax.nn.sigmoid(act)

        # ---- only recurrent matmul: entities @ Wv^T ----
        # Runs on the unnormalized carry v; norm folded in after the matmul:
        #   (s*v) @ Wv^T == s * (v @ Wv^T)
        # so the MXU never waits on the previous step's rsqrt.
        vw = jnp.einsum('bed,bfd->bef', v, wv_b, preferred_element_type=f32)     # (B, E, D)
        oe = s * vw

        # ---- gated update (opt.act == 'I', 'n' not in opt.afunc; PReLU unused) ----
        n_dist = dist[:, :, None]                                     # (B, E, 1)
        new_v = n_dist * (oe + ok + oc[:, None, :]) + (1.0 - n_dist) * e_scaled

        # ---- per-entity L2 normalization: new * (1/||new||_2), no eps ----
        # (matches the reference module exactly; NaN hazard only if a row is exactly 0)
        s = lax.rsqrt(jnp.sum(new_v * new_v, axis=2, keepdims=True))  # (B, E, 1)
        v = new_v

    entities = v * s                                                  # final normalized (B, E, D)
    # joint = (n_dist * entities).sum(1): last step's dist, final (normalized) entities.
    joint = jnp.sum(dist[:, :, None] * entities, axis=1)              # (B, D)

    ents_out_ref[...] = entities
    joint_out_ref[...] = joint


def entnet_forward(keys, sent_embs, wk, wv, wc):
    """keys: (B,E,D) f32; sent_embs: (T,B,D) f32; wk/wv/wc: (D,D) f32 (nn.Linear layout)."""
    B, E, D = keys.shape
    assert sent_embs.shape[1:] == (B, D)
    assert wk.shape == (D, D) and wv.shape == (D, D) and wc.shape == (D, D)

    entities, joint = pl.pallas_call(
        entnet_kernel,
        out_shape=(
            jax.ShapeDtypeStruct((B, E, D), jnp.float32),
            jax.ShapeDtypeStruct((B, D), jnp.float32),
        ),
    )(keys, sent_embs, wk, wv, wc)

    sel_loss = jnp.float32(0.0)   # entity_labels is None in this forward
    return entities, joint, sel_loss


def weighted_bow(word_emb, pos_mask, sentences, lengths):
    """Plain-JAX glue sentence encoder (WeightedBOW approximation).

    sentences: (T, B, S) int32 word ids, lengths: (T, B) int32.
    Returns (T, B, D) f32 sentence embeddings.
    """
    T, B, S = sentences.shape
    emb = word_emb[sentences]                                      # (T, B, S, D)
    len_mask = (jnp.arange(S)[None, None, :] < lengths[:, :, None]).astype(jnp.float32)
    weighted = emb * pos_mask[None, None, :S, :] * len_mask[..., None]
    return weighted.sum(axis=2)                                    # (T, B, D)


if __name__ == "__main__":
    # Small shapes consistent with the module.
    B = 2          # batch
    E = 8          # opt.ents  (number of entities)
    D = 32         # opt.eSize == opt.hSize (entity / hidden size)
    T = 4          # number of sentences
    S = 8          # seq_len / max_words
    VOCAB = 50

    root = jax.random.PRNGKey(0)
    k_keyinit, k_wordemb, k_posmask, k_wk, k_wv, k_wc, k_sent, k_len = \
        jax.random.split(root, 8)

    # Deterministic synthetic parameters (shapes from __init__).
    key_init_table = jax.random.normal(k_keyinit, (E, D), jnp.float32) * 0.1   # nn.Embedding(ents, eSize)
    word_emb = jax.random.normal(k_wordemb, (VOCAB, D), jnp.float32) * 0.1     # encoder word embeddings
    pos_mask = jax.random.uniform(k_posmask, (S, D), jnp.float32)              # positional mask (max_words x eSize)
    wk = jax.random.normal(k_wk, (D, D), jnp.float32) * 0.1                    # key_applicator (eSize, eSize), no bias
    wv = jax.random.normal(k_wv, (D, D), jnp.float32) * 0.1                    # val_applicator (eSize, eSize), no bias
    wc = jax.random.normal(k_wc, (D, D), jnp.float32) * 0.1                    # ctx_applicator (eSize, hSize), no bias

    # Synthetic inputs.
    sentences = jax.random.randint(k_sent, (T, B, S), 0, VOCAB, jnp.int32)
    lengths = jax.random.randint(k_len, (T, B), 3, S + 1, jnp.int32)

    # initialize_entities: entity_ids = arange(ents) expanded over batch; keys = entities = key_init(ids).
    keys = jnp.broadcast_to(key_init_table[None, :, :], (B, E, D)).astype(jnp.float32)

    # Sentence encoder (glue).
    sent_embs = weighted_bow(word_emb, pos_mask, sentences, lengths)           # (T, B, D)

    entities, joint, sel_loss = jax.jit(entnet_forward)(keys, sent_embs, wk, wv, wc)
    jax.block_until_ready((entities, joint, sel_loss))

    assert entities.shape == (B, E, D)
    assert joint.shape == (B, D)
    assert bool(jnp.all(jnp.isfinite(entities))) and bool(jnp.all(jnp.isfinite(joint)))
    print("KERNEL_OK")
</pallas_src>

<mosaic_0001>
module attributes {stable_mosaic.version = 11 : i64} {
  func.func @entnet_kernel(%arg0: memref<2x8x32xf32, #tpu.memory_space<vmem>>, %arg1: memref<4x2x32xf32, #tpu.memory_space<vmem>>, %arg2: memref<32x32xf32, #tpu.memory_space<vmem>>, %arg3: memref<32x32xf32, #tpu.memory_space<vmem>>, %arg4: memref<32x32xf32, #tpu.memory_space<vmem>>, %arg5: memref<2x8x32xf32, #tpu.memory_space<vmem>>, %arg6: memref<2x32xf32, #tpu.memory_space<vmem>>) attributes {dimension_semantics = [], scalar_prefetch = 0 : i64, scratch_operands = 0 : i64, tpu.core_type = #tpu.core_type<tc>} {
    %c0 = arith.constant 0 : index
    %c0_0 = arith.constant 0 : index
    %c0_1 = arith.constant 0 : index
    %0 = vector.load %arg0[%c0, %c0_0, %c0_1] : memref<2x8x32xf32, #tpu.memory_space<vmem>>, vector<2x8x32xf32>
    %c0_2 = arith.constant 0 : index
    %c0_3 = arith.constant 0 : index
    %c0_4 = arith.constant 0 : index
    %1 = vector.load %arg1[%c0_2, %c0_3, %c0_4] : memref<4x2x32xf32, #tpu.memory_space<vmem>>, vector<4x2x32xf32>
    %c0_5 = arith.constant 0 : index
    %c0_6 = arith.constant 0 : index
    %2 = vector.load %arg2[%c0_5, %c0_6] : memref<32x32xf32, #tpu.memory_space<vmem>>, vector<32x32xf32>
    %c0_7 = arith.constant 0 : index
    %c0_8 = arith.constant 0 : index
    %3 = vector.load %arg3[%c0_7, %c0_8] : memref<32x32xf32, #tpu.memory_space<vmem>>, vector<32x32xf32>
    %c0_9 = arith.constant 0 : index
    %c0_10 = arith.constant 0 : index
    %4 = vector.load %arg4[%c0_9, %c0_10] : memref<32x32xf32, #tpu.memory_space<vmem>>, vector<32x32xf32>
    %5 = vector.shape_cast %2 : vector<32x32xf32> to vector<1x32x32xf32>
    %6 = vector.shape_cast %5 : vector<1x32x32xf32> to vector<1x32x32xf32>
    %7 = vector.broadcast %6 : vector<1x32x32xf32> to vector<2x32x32xf32>
    %8 = vector.shape_cast %3 : vector<32x32xf32> to vector<1x32x32xf32>
    %9 = vector.shape_cast %8 : vector<1x32x32xf32> to vector<1x32x32xf32>
    %10 = vector.broadcast %9 : vector<1x32x32xf32> to vector<2x32x32xf32>
    %11 = vector.shape_cast %4 : vector<32x32xf32> to vector<1x32x32xf32>
    %12 = vector.shape_cast %11 : vector<1x32x32xf32> to vector<1x32x32xf32>
    %13 = vector.broadcast %12 : vector<1x32x32xf32> to vector<4x32x32xf32>
    "tpu.trace_start"() <{level = 10 : i32, message = "bed,bfd->bef"}> : () -> ()
    %cst = arith.constant dense<0.000000e+00> : vector<2x8x32xf32>
    %14 = tpu.matmul %0, %7, %cst {dimension_numbers = #tpu.dot_dimension_numbers<[2], [2], [1], [1], [0, 0, 0, 1, 1, 1], [0], [0]>} : vector<2x8x32xf32>, vector<2x32x32xf32>, vector<2x8x32xf32> -> vector<2x8x32xf32>
    "tpu.trace_stop"() : () -> ()
    "tpu.trace_start"() <{level = 10 : i32, message = "tbd,tfd->tbf"}> : () -> ()
    %cst_11 = arith.constant dense<0.000000e+00> : vector<4x2x32xf32>
    %15 = tpu.matmul %1, %13, %cst_11 {dimension_numbers = #tpu.dot_dimension_numbers<[2], [2], [1], [1], [0, 0, 0, 1, 1, 1], [0], [0]>} : vector<4x2x32xf32>, vector<4x32x32xf32>, vector<4x2x32xf32> -> vector<4x2x32xf32>
    %cst_12 = arith.constant 1.000000e+00 : f32
    "tpu.trace_stop"() : () -> ()
    %16 = vector.broadcast %cst_12 : f32 to vector<2x8x1xf32>
    %17 = vector.extract_strided_slice %1 {offsets = [0, 0, 0], sizes = [1, 2, 32], strides = [1, 1, 1]} : vector<4x2x32xf32> to vector<1x2x32xf32>
    %18 = vector.shape_cast %17 : vector<1x2x32xf32> to vector<2x32xf32>
    %19 = vector.extract_strided_slice %15 {offsets = [0, 0, 0], sizes = [1, 2, 32], strides = [1, 1, 1]} : vector<4x2x32xf32> to vector<1x2x32xf32>
    %20 = vector.shape_cast %19 : vector<1x2x32xf32> to vector<2x32xf32>
    %21 = vector.broadcast %16 : vector<2x8x1xf32> to vector<2x8x32xf32>
    %22 = arith.mulf %21, %0 : vector<2x8x32xf32>
    %23 = arith.addf %0, %22 : vector<2x8x32xf32>
    %24 = vector.shape_cast %18 : vector<2x32xf32> to vector<2x1x32xf32>
    %25 = vector.broadcast %24 : vector<2x1x32xf32> to vector<2x8x32xf32>
    %26 = arith.mulf %23, %25 : vector<2x8x32xf32>
    %cst_13 = arith.constant dense<0.000000e+00> : vector<2x8xf32>
    %27 = vector.multi_reduction <add>, %26, %cst_13 [2] : vector<2x8x32xf32> to vector<2x8xf32>
    %28 = arith.negf %27 : vector<2x8xf32>
    %29 = math.exp %28 : vector<2x8xf32>
    %cst_14 = arith.constant 1.000000e+00 : f32
    %30 = vector.broadcast %cst_14 : f32 to vector<2x8xf32>
    %31 = arith.addf %30, %29 : vector<2x8xf32>
    %32 = arith.divf %30, %31 : vector<2x8xf32>
    "tpu.trace_start"() <{level = 10 : i32, message = "bed,bfd->bef"}> : () -> ()
    %cst_15 = arith.constant dense<0.000000e+00> : vector<2x8x32xf32>
    %33 = tpu.matmul %0, %10, %cst_15 {dimension_numbers = #tpu.dot_dimension_numbers<[2], [2], [1], [1], [0, 0, 0, 1, 1, 1], [0], [0]>} : vector<2x8x32xf32>, vector<2x32x32xf32>, vector<2x8x32xf32> -> vector<2x8x32xf32>
    "tpu.trace_stop"() : () -> ()
    %34 = vector.broadcast %16 : vector<2x8x1xf32> to vector<2x8x32xf32>
    %35 = arith.mulf %34, %33 : vector<2x8x32xf32>
    %36 = vector.shape_cast %32 : vector<2x8xf32> to vector<2x8x1xf32>
    %37 = arith.addf %35, %14 : vector<2x8x32xf32>
    %38 = vector.shape_cast %20 : vector<2x32xf32> to vector<2x1x32xf32>
    %39 = vector.broadcast %38 : vector<2x1x32xf32> to vector<2x8x32xf32>
    %40 = arith.addf %37, %39 : vector<2x8x32xf32>
    %41 = vector.broadcast %36 : vector<2x8x1xf32> to vector<2x8x32xf32>
    %42 = arith.mulf %41, %40 : vector<2x8x32xf32>
    %cst_16 = arith.constant 1.000000e+00 : f32
    %43 = vector.broadcast %cst_16 : f32 to vector<2x8x1xf32>
    %44 = arith.subf %43, %36 : vector<2x8x1xf32>
    %45 = vector.broadcast %44 : vector<2x8x1xf32> to vector<2x8x32xf32>
    %46 = arith.mulf %45, %22 : vector<2x8x32xf32>
    %47 = arith.addf %42, %46 : vector<2x8x32xf32>
    %48 = arith.mulf %47, %47 : vector<2x8x32xf32>
    %cst_17 = arith.constant dense<0.000000e+00> : vector<2x8xf32>
    %49 = vector.multi_reduction <add>, %48, %cst_17 [2] : vector<2x8x32xf32> to vector<2x8xf32>
    %50 = vector.shape_cast %49 : vector<2x8xf32> to vector<2x8x1xf32>
    %51 = math.rsqrt %50 : vector<2x8x1xf32>
    %52 = vector.extract_strided_slice %1 {offsets = [1, 0, 0], sizes = [1, 2, 32], strides = [1, 1, 1]} : vector<4x2x32xf32> to vector<1x2x32xf32>
    %53 = vector.shape_cast %52 : vector<1x2x32xf32> to vector<2x32xf32>
    %54 = vector.extract_strided_slice %15 {offsets = [1, 0, 0], sizes = [1, 2, 32], strides = [1, 1, 1]} : vector<4x2x32xf32> to vector<1x2x32xf32>
    %55 = vector.shape_cast %54 : vector<1x2x32xf32> to vector<2x32xf32>
    %56 = vector.broadcast %51 : vector<2x8x1xf32> to vector<2x8x32xf32>
    %57 = arith.mulf %56, %47 : vector<2x8x32xf32>
    %58 = arith.addf %0, %57 : vector<2x8x32xf32>
    %59 = vector.shape_cast %53 : vector<2x32xf32> to vector<2x1x32xf32>
    %60 = vector.broadcast %59 : vector<2x1x32xf32> to vector<2x8x32xf32>
    %61 = arith.mulf %58, %60 : vector<2x8x32xf32>
    %cst_18 = arith.constant dense<0.000000e+00> : vector<2x8xf32>
    %62 = vector.multi_reduction <add>, %61, %cst_18 [2] : vector<2x8x32xf32> to vector<2x8xf32>
    %63 = arith.negf %62 : vector<2x8xf32>
    %64 = math.exp %63 : vector<2x8xf32>
    %cst_19 = arith.constant 1.000000e+00 : f32
    %65 = vector.broadcast %cst_19 : f32 to vector<2x8xf32>
    %66 = arith.addf %65, %64 : vector<2x8xf32>
    %67 = arith.divf %65, %66 : vector<2x8xf32>
    "tpu.trace_start"() <{level = 10 : i32, message = "bed,bfd->bef"}> : () -> ()
    %cst_20 = arith.constant dense<0.000000e+00> : vector<2x8x32xf32>
    %68 = tpu.matmul %47, %10, %cst_20 {dimension_numbers = #tpu.dot_dimension_numbers<[2], [2], [1], [1], [0, 0, 0, 1, 1, 1], [0], [0]>} : vector<2x8x32xf32>, vector<2x32x32xf32>, vector<2x8x32xf32> -> vector<2x8x32xf32>
    "tpu.trace_stop"() : () -> ()
    %69 = vector.broadcast %51 : vector<2x8x1xf32> to vector<2x8x32xf32>
    %70 = arith.mulf %69, %68 : vector<2x8x32xf32>
    %71 = vector.shape_cast %67 : vector<2x8xf32> to vector<2x8x1xf32>
    %72 = arith.addf %70, %14 : vector<2x8x32xf32>
    %73 = vector.shape_cast %55 : vector<2x32xf32> to vector<2x1x32xf32>
    %74 = vector.broadcast %73 : vector<2x1x32xf32> to vector<2x8x32xf32>
    %75 = arith.addf %72, %74 : vector<2x8x32xf32>
    %76 = vector.broadcast %71 : vector<2x8x1xf32> to vector<2x8x32xf32>
    %77 = arith.mulf %76, %75 : vector<2x8x32xf32>
    %cst_21 = arith.constant 1.000000e+00 : f32
    %78 = vector.broadcast %cst_21 : f32 to vector<2x8x1xf32>
    %79 = arith.subf %78, %71 : vector<2x8x1xf32>
    %80 = vector.broadcast %79 : vector<2x8x1xf32> to vector<2x8x32xf32>
    %81 = arith.mulf %80, %57 : vector<2x8x32xf32>
    %82 = arith.addf %77, %81 : vector<2x8x32xf32>
    %83 = arith.mulf %82, %82 : vector<2x8x32xf32>
    %cst_22 = arith.constant dense<0.000000e+00> : vector<2x8xf32>
    %84 = vector.multi_reduction <add>, %83, %cst_22 [2] : vector<2x8x32xf32> to vector<2x8xf32>
    %85 = vector.shape_cast %84 : vector<2x8xf32> to vector<2x8x1xf32>
    %86 = math.rsqrt %85 : vector<2x8x1xf32>
    %87 = vector.extract_strided_slice %1 {offsets = [2, 0, 0], sizes = [1, 2, 32], strides = [1, 1, 1]} : vector<4x2x32xf32> to vector<1x2x32xf32>
    %88 = vector.shape_cast %87 : vector<1x2x32xf32> to vector<2x32xf32>
    %89 = vector.extract_strided_slice %15 {offsets = [2, 0, 0], sizes = [1, 2, 32], strides = [1, 1, 1]} : vector<4x2x32xf32> to vector<1x2x32xf32>
    %90 = vector.shape_cast %89 : vector<1x2x32xf32> to vector<2x32xf32>
    %91 = vector.broadcast %86 : vector<2x8x1xf32> to vector<2x8x32xf32>
    %92 = arith.mulf %91, %82 : vector<2x8x32xf32>
    %93 = arith.addf %0, %92 : vector<2x8x32xf32>
    %94 = vector.shape_cast %88 : vector<2x32xf32> to vector<2x1x32xf32>
    %95 = vector.broadcast %94 : vector<2x1x32xf32> to vector<2x8x32xf32>
    %96 = arith.mulf %93, %95 : vector<2x8x32xf32>
    %cst_23 = arith.constant dense<0.000000e+00> : vector<2x8xf32>
    %97 = vector.multi_reduction <add>, %96, %cst_23 [2] : vector<2x8x32xf32> to vector<2x8xf32>
    %98 = arith.negf %97 : vector<2x8xf32>
    %99 = math.exp %98 : vector<2x8xf32>
    %cst_24 = arith.constant 1.000000e+00 : f32
    %100 = vector.broadcast %cst_24 : f32 to vector<2x8xf32>
    %101 = arith.addf %100, %99 : vector<2x8xf32>
    %102 = arith.divf %100, %101 : vector<2x8xf32>
    "tpu.trace_start"() <{level = 10 : i32, message = "bed,bfd->bef"}> : () -> ()
    %cst_25 = arith.constant dense<0.000000e+00> : vector<2x8x32xf32>
    %103 = tpu.matmul %82, %10, %cst_25 {dimension_numbers = #tpu.dot_dimension_numbers<[2], [2], [1], [1], [0, 0, 0, 1, 1, 1], [0], [0]>} : vector<2x8x32xf32>, vector<2x32x32xf32>, vector<2x8x32xf32> -> vector<2x8x32xf32>
    "tpu.trace_stop"() : () -> ()
    %104 = vector.broadcast %86 : vector<2x8x1xf32> to vector<2x8x32xf32>
    %105 = arith.mulf %104, %103 : vector<2x8x32xf32>
    %106 = vector.shape_cast %102 : vector<2x8xf32> to vector<2x8x1xf32>
    %107 = arith.addf %105, %14 : vector<2x8x32xf32>
    %108 = vector.shape_cast %90 : vector<2x32xf32> to vector<2x1x32xf32>
    %109 = vector.broadcast %108 : vector<2x1x32xf32> to vector<2x8x32xf32>
    %110 = arith.addf %107, %109 : vector<2x8x32xf32>
    %111 = vector.broadcast %106 : vector<2x8x1xf32> to vector<2x8x32xf32>
    %112 = arith.mulf %111, %110 : vector<2x8x32xf32>
    %cst_26 = arith.constant 1.000000e+00 : f32
    %113 = vector.broadcast %cst_26 : f32 to vector<2x8x1xf32>
    %114 = arith.subf %113, %106 : vector<2x8x1xf32>
    %115 = vector.broadcast %114 : vector<2x8x1xf32> to vector<2x8x32xf32>
    %116 = arith.mulf %115, %92 : vector<2x8x32xf32>
    %117 = arith.addf %112, %116 : vector<2x8x32xf32>
    %118 = arith.mulf %117, %117 : vector<2x8x32xf32>
    %cst_27 = arith.constant dense<0.000000e+00> : vector<2x8xf32>
    %119 = vector.multi_reduction <add>, %118, %cst_27 [2] : vector<2x8x32xf32> to vector<2x8xf32>
    %120 = vector.shape_cast %119 : vector<2x8xf32> to vector<2x8x1xf32>
    %121 = math.rsqrt %120 : vector<2x8x1xf32>
    %122 = vector.extract_strided_slice %1 {offsets = [3, 0, 0], sizes = [1, 2, 32], strides = [1, 1, 1]} : vector<4x2x32xf32> to vector<1x2x32xf32>
    %123 = vector.shape_cast %122 : vector<1x2x32xf32> to vector<2x32xf32>
    %124 = vector.extract_strided_slice %15 {offsets = [3, 0, 0], sizes = [1, 2, 32], strides = [1, 1, 1]} : vector<4x2x32xf32> to vector<1x2x32xf32>
    %125 = vector.shape_cast %124 : vector<1x2x32xf32> to vector<2x32xf32>
    %126 = vector.broadcast %121 : vector<2x8x1xf32> to vector<2x8x32xf32>
    %127 = arith.mulf %126, %117 : vector<2x8x32xf32>
    %128 = arith.addf %0, %127 : vector<2x8x32xf32>
    %129 = vector.shape_cast %123 : vector<2x32xf32> to vector<2x1x32xf32>
    %130 = vector.broadcast %129 : vector<2x1x32xf32> to vector<2x8x32xf32>
    %131 = arith.mulf %128, %130 : vector<2x8x32xf32>
    %cst_28 = arith.constant dense<0.000000e+00> : vector<2x8xf32>
    %132 = vector.multi_reduction <add>, %131, %cst_28 [2] : vector<2x8x32xf32> to vector<2x8xf32>
    %133 = arith.negf %132 : vector<2x8xf32>
    %134 = math.exp %133 : vector<2x8xf32>
    %cst_29 = arith.constant 1.000000e+00 : f32
    %135 = vector.broadcast %cst_29 : f32 to vector<2x8xf32>
    %136 = arith.addf %135, %134 : vector<2x8xf32>
    %137 = arith.divf %135, %136 : vector<2x8xf32>
    "tpu.trace_start"() <{level = 10 : i32, message = "bed,bfd->bef"}> : () -> ()
    %cst_30 = arith.constant dense<0.000000e+00> : vector<2x8x32xf32>
    %138 = tpu.matmul %117, %10, %cst_30 {dimension_numbers = #tpu.dot_dimension_numbers<[2], [2], [1], [1], [0, 0, 0, 1, 1, 1], [0], [0]>} : vector<2x8x32xf32>, vector<2x32x32xf32>, vector<2x8x32xf32> -> vector<2x8x32xf32>
    "tpu.trace_stop"() : () -> ()
    %139 = vector.broadcast %121 : vector<2x8x1xf32> to vector<2x8x32xf32>
    %140 = arith.mulf %139, %138 : vector<2x8x32xf32>
    %141 = vector.shape_cast %137 : vector<2x8xf32> to vector<2x8x1xf32>
    %142 = arith.addf %140, %14 : vector<2x8x32xf32>
    %143 = vector.shape_cast %125 : vector<2x32xf32> to vector<2x1x32xf32>
    %144 = vector.broadcast %143 : vector<2x1x32xf32> to vector<2x8x32xf32>
    %145 = arith.addf %142, %144 : vector<2x8x32xf32>
    %146 = vector.broadcast %141 : vector<2x8x1xf32> to vector<2x8x32xf32>
    %147 = arith.mulf %146, %145 : vector<2x8x32xf32>
    %cst_31 = arith.constant 1.000000e+00 : f32
    %148 = vector.broadcast %cst_31 : f32 to vector<2x8x1xf32>
    %149 = arith.subf %148, %141 : vector<2x8x1xf32>
    %150 = vector.broadcast %149 : vector<2x8x1xf32> to vector<2x8x32xf32>
    %151 = arith.mulf %150, %127 : vector<2x8x32xf32>
    %152 = arith.addf %147, %151 : vector<2x8x32xf32>
    %153 = arith.mulf %152, %152 : vector<2x8x32xf32>
    %cst_32 = arith.constant dense<0.000000e+00> : vector<2x8xf32>
    %154 = vector.multi_reduction <add>, %153, %cst_32 [2] : vector<2x8x32xf32> to vector<2x8xf32>
    %155 = vector.shape_cast %154 : vector<2x8xf32> to vector<2x8x1xf32>
    %156 = math.rsqrt %155 : vector<2x8x1xf32>
    %157 = vector.broadcast %156 : vector<2x8x1xf32> to vector<2x8x32xf32>
    %158 = arith.mulf %152, %157 : vector<2x8x32xf32>
    %159 = vector.shape_cast %137 : vector<2x8xf32> to vector<2x8x1xf32>
    %160 = vector.broadcast %159 : vector<2x8x1xf32> to vector<2x8x32xf32>
    %161 = arith.mulf %160, %158 : vector<2x8x32xf32>
    %cst_33 = arith.constant dense<0.000000e+00> : vector<2x32xf32>
    %162 = vector.multi_reduction <add>, %161, %cst_33 [1] : vector<2x8x32xf32> to vector<2x32xf32>
    %c0_34 = arith.constant 0 : index
    %c0_35 = arith.constant 0 : index
    %c0_36 = arith.constant 0 : index
    %163 = vector.load %arg5[%c0_34, %c0_35, %c0_36] : memref<2x8x32xf32, #tpu.memory_space<vmem>>, vector<2x8x32xf32>
    tpu.vector_store %arg5[%c0_34, %c0_35, %c0_36], %158 {strides = array<i32>} : memref<2x8x32xf32, #tpu.memory_space<vmem>>, vector<2x8x32xf32>,
    %c0_37 = arith.constant 0 : index
    %c0_38 = arith.constant 0 : index
    %164 = vector.load %arg6[%c0_37, %c0_38] : memref<2x32xf32, #tpu.memory_space<vmem>>, vector<2x32xf32>
    tpu.vector_store %arg6[%c0_37, %c0_38], %162 {strides = array<i32>} : memref<2x32xf32, #tpu.memory_space<vmem>>, vector<2x32xf32>,
    return
  }
}

</mosaic_0001>

<bundles_post_ra>
// kernel: entnet_forward.1
= control target key start
LH: loop header
LB: loop body
LE: loop exit
PB: predicated region body
PF: predicated region fallthrough
CT: control target
= control target key end

     0   :  { %12 = vsyncpa [#allocation3], 0  ;;  %s2579_s0 = inlined_call_operand.hbm [shape: f32[2,8,32], index: 0, kind: input, shape index: {}]   ;;  %s2580_s1 = inlined_call_operand.hbm [shape: f32[4,2,32], index: 1, kind: input, shape index: {}]   ;;  %s2581_s2 = inlined_call_operand.hbm [shape: f32[32,32], index: 2, kind: input, shape index: {}]   ;;  %s2582_s3 = inlined_call_operand.hbm [shape: f32[32,32], index: 3, kind: input, shape index: {}]   ;;  %s2583_s4 = inlined_call_operand.hbm [shape: f32[32,32], index: 4, kind: input, shape index: {}]   ;;  %s2584_s5 = inlined_call_operand.hbm [shape: f32[2,8,32], index: 5, kind: output, shape index: {0}]   ;;  %s2585_s6 = inlined_call_operand.hbm [shape: f32[2,32], index: 6, kind: output, shape index: {1}]  }
   0x1   :  { %13 = vsyncpa [#allocation6], 0 }
   0x2   :  { %14 = vsyncpa [#allocation9], 0 }
   0x3   :  { %15 = vsyncpa [#allocation4], 0 }
   0x4   :  { %16 = vsyncpa [#allocation13], 0  ;;  %s2183_s21 = smov [#allocation5]  }
   0x5   :  { %s34_s22 = sshll.u32 %s2183_s21, 4  ;;  %s35_s22 = int_to_ptr.vmem [resolvable:$true] %s34_s22 }
   0x6   :  { %s2041_s23 = scalar_lea.vmem %s35_s22, 128  ;;  %p2046_p1 = scmp.lt.s32.totalorder %s35_s22, %s35_s22 }
   0x7   :  { %p2042_p0 = scmp.ne.s32.totalorder %s35_s22, %s2041_s23  ;;  %p2047_p2 = scmp.lt.s32.totalorder %s2041_s23, %s2041_s23 }
   0x9   :  { %p2048_p3 = por %p2047_p2, %p2046_p1 }
   0xb   :  { %p2049_p4 = pnand %p2048_p3, %p2042_p0 }
   0xd   :  { %2052 = shalt.err (!%p2049_p4)
}
   0xe   :  { %s2184_s24 = smov 32   ;;  %s2185_s25 = smov 2  }
   0xf   :  { %40 = dma.hbm_to_vmem [thread:$0]  %s2580_s1, 128, %s35_s22, [#allocation6], %s2184_s24, %s2184_s24, %s2185_s25  }
  0x10   :  { %s2186_s28 = smov [#allocation8]   ;;  %s2187_s30 = smov [#allocation2]  }
  0x11   :  { %s58_s29 = sshll.u32 %s2186_s28, 4  ;;  %s22_s7 = sshll.u32 %s2187_s30, 4  ;;  %s59_s29 = int_to_ptr.vmem [resolvable:$true] %s58_s29  ;;  %s23_s7 = int_to_ptr.vmem [resolvable:$true] %s22_s7 }
  0x12   :  { %s2061_s8 = scalar_lea.vmem %s59_s29, 512  ;;  %p2066_p6 = scmp.lt.s32.totalorder %s59_s29, %s59_s29 }
  0x13   :  { %p2062_p5 = scmp.ne.s32.totalorder %s59_s29, %s2061_s8  ;;  %p2067_p7 = scmp.lt.s32.totalorder %s2061_s8, %s2061_s8 }
  0x15   :  { %p2068_p8 = por %p2067_p7, %p2066_p6 }
  0x17   :  { %p2069_p9 = pnand %p2068_p8, %p2062_p5 }
  0x19   :  { %2072 = shalt.err (!%p2069_p9)
}
  0x1a   :  { %s2188_s9 = smov 128   ;;  %s2189_s10 = smov 8  }
  0x1b   :  { %64 = dma.hbm_to_vmem [thread:$0]  %s2582_s3, 512, %s59_s29, [#allocation9], %s2188_s9, %s2188_s9, %s2189_s10  }
  0x1c   :  { %s2081_s1 = scalar_lea.vmem %s23_s7, 256  ;;  %p2086_p11 = scmp.lt.s32.totalorder %s23_s7, %s23_s7 }
  0x1d   :  { %p2082_p10 = scmp.ne.s32.totalorder %s23_s7, %s2081_s1  ;;  %p2087_p12 = scmp.lt.s32.totalorder %s2081_s1, %s2081_s1 }
  0x1f   :  { %p2088_p13 = por %p2087_p12, %p2086_p11 }
  0x21   :  { %p2089_p0 = pnand %p2088_p13, %p2082_p10 }
  0x23   :  { %2092 = shalt.err (!%p2089_p0)
}
  0x24   :  { %28 = dma.hbm_to_vmem [thread:$0]  %s2579_s0, 256, %s23_s7, [#allocation3], %s2188_s9, %s2188_s9, %s2189_s10  }
  0x25   :  { %s2190_s15 = smov [#allocation7]   ;;  %s2191_s17 = smov [#allocation10]  }
  0x26   :  { %s46_s16 = sshll.u32 %s2190_s15, 4  ;;  %s70_s3 = sshll.u32 %s2191_s17, 4  ;;  %s47_s16 = int_to_ptr.vmem [resolvable:$true] %s46_s16  ;;  %s71_s3 = int_to_ptr.vmem [resolvable:$true] %s70_s3 }
  0x27   :  { %s2101_s18 = scalar_lea.vmem %s47_s16, 512  ;;  %p2106_p2 = scmp.lt.s32.totalorder %s47_s16, %s47_s16 }
  0x28   :  { %p2102_p1 = scmp.ne.s32.totalorder %s47_s16, %s2101_s18  ;;  %p2107_p3 = scmp.lt.s32.totalorder %s2101_s18, %s2101_s18 }
  0x2a   :  { %p2108_p4 = por %p2107_p3, %p2106_p2 }
  0x2c   :  { %p2109_p5 = pnand %p2108_p4, %p2102_p1 }
  0x2e   :  { %2112 = shalt.err (!%p2109_p5)
}
  0x2f   :  { %52 = dma.hbm_to_vmem [thread:$0]  %s2581_s2, 512, %s47_s16, [#allocation6], %s2188_s9, %s2188_s9, %s2189_s10  }
  0x30   :  { %s2121_s0 = scalar_lea.vmem %s71_s3, 512  ;;  %p2126_p7 = scmp.lt.s32.totalorder %s71_s3, %s71_s3 }
  0x31   :  { %p2122_p6 = scmp.ne.s32.totalorder %s71_s3, %s2121_s0  ;;  %p2127_p8 = scmp.lt.s32.totalorder %s2121_s0, %s2121_s0 }
  0x33   :  { %p2128_p9 = por %p2127_p8, %p2126_p7 }
  0x35   :  { %p2129_p10 = pnand %p2128_p9, %p2122_p6 }
  0x37   :  { %2132 = shalt.err (!%p2129_p10)
}
  0x38   :  { %76 = dma.hbm_to_vmem [thread:$0]  %s2583_s4, 512, %s71_s3, [#allocation9], %s2188_s9, %s2188_s9, %s2189_s10  }
  0x39   :  { %2173 = dma.done.wait [#allocation3], 256  }
  0x3a   :  { %2174 = vsyncadd [#allocation3], 4294967040 }
  0x3b   :  { %2175 = dma.done.wait [#allocation6], 640  }
  0x3c   :  { %2176 = vsyncadd [#allocation6], 4294966656 }
  0x3d   :  { %2177 = dma.done.wait [#allocation9], 1024  }
  0x3e   :  { %2178 = vsyncadd [#allocation9], 4294966272  ;;  %v578_v0 = vlaneseq  ;;  %v2192_v1 = vmov 0.0   ;;  %vm2193_vm0 = vmmov 0   ;;  %v2194_v2 = vmov 1966171168  }
  0x3f   :  { %1817 = vmatprep.subr.mxu0 %v2192_v1  ;;  %1828 = vmatprep.subr.mxu1 %v2192_v1  ;;  %v576_v3 = vunpack.c.l.s4 %v2194_v2  ;;  %vm110_vm1 = vcmask 261120   ;;  %v101_v6 = vld [vmem:[#allocation7 + $0x18] sm:$0xff]  ;;  %v100_v8 = vld [vmem:[#allocation7 + $0x10] sm:$0xff]  ;;  %v2276_v12 = vld [vmem:[#allocation2] sm:$0xff]  ;;  %s2195_s2 = smov [#allocation11]  }
  0x40   :  { %1825 = vmatprep.mubr.msk.f32.mxu0 %vm2193_vm0, %v2192_v1  ;;  %1836 = vmatprep.mubr.msk.f32.mxu1 %vm2193_vm0, %v2192_v1  ;;  %v579_v4 = vshrl.u32 %v578_v0, 7  ;;  %v94_v9 = vld [vmem:[#allocation5] sm:$0x3]  ;;  %v99_v13 = vld [vmem:[#allocation7 + $0x8] sm:$0xff]  ;;  %v573_v14 = vadd.f32 %v2276_v12, %v2276_v12  ;;  %v2283_v17 = vld [vmem:[#allocation2 + $0x8] sm:$0xff]  ;;  %s1641_s4 = sshll.u32 %s2195_s2, 4  ;;  %s1642_s4 = int_to_ptr.vmem [resolvable:$true] %s1641_s4 }
  0x41   :  { %v577_v5 = vunpack.c.0.s8 %v576_v3  ;;  %1818 = vmatpush3.xpose.msk.msra.mxu0 %vm110_vm1, %v101_v6  ;;  %1829 = vmatpush3.xpose.msk.msra.mxu1 %vm110_vm1, %v101_v6  ;;  %v574_v20 = vadd.f32 %v2283_v17, %v2283_v17  ;;  %v98_v21 = vld [vmem:[#allocation7] sm:$0xff]  ;;  %v109_v26 = vld [vmem:[#allocation10 + $0x18] sm:$0xff]  ;;  %v108_v28 = vld [vmem:[#allocation10 + $0x10] sm:$0xff]  ;;  %s2133_s23 = scalar_lea.vmem %s1642_s4, 256  ;;  %p2138_p12 = scmp.lt.s32.totalorder %s1642_s4, %s1642_s4 }
  0x42   :  { %1819 = vmatprep.subr.mxu0 %v2192_v1  ;;  %1830 = vmatprep.subr.mxu1 %v2192_v1  ;;  %v2272_v11 = vsub.s32 0, %v579_v4  ;;  %v107_v29 = vld [vmem:[#allocation10 + $0x8] sm:$0xff]  ;;  %v106_v30 = vld [vmem:[#allocation10] sm:$0xff]  ;;  %v2322_v31 = vld [vmem:[#allocation5 + $0x2] sm:$0x3]  ;;  %p2134_p11 = scmp.ne.s32.totalorder %s1642_s4, %s2133_s23  ;;  %p2139_p13 = scmp.lt.s32.totalorder %s2133_s23, %s2133_s23 }
  0x43   :  { %v2265_v7 = vsub.s32 %v577_v5, %v579_v4  ;;  %v2347_v32 = vld [vmem:[#allocation5 + $0x4] sm:$0x3]  ;;  %v2349_v33 = vld [vmem:[#allocation5 + $0x6] sm:$0x3]  ;;  %v2365_v35 = vld [vmem:[#allocation8 + $0x10] sm:$0xff] }
  0x44   :  { %v2353_v34 = vld [vmem:[#allocation8 + $0x18] sm:$0xff]  ;;  %v2377_v36 = vld [vmem:[#allocation8 + $0x8] sm:$0xff]  ;;  %v2385_v37 = vld [vmem:[#allocation8] sm:$0xff]  ;;  %p2140_p0 = por %p2139_p13, %p2138_p12 }
  0x45   :  { %v581_v10 = vrot.slane %v94_v9, %v2265_v7  ;;  %1820 = vmatpush3.xpose.msk.msra.mxu0 %vm110_vm1, %v100_v8  ;;  %1831 = vmatpush3.xpose.msk.msra.mxu1 %vm110_vm1, %v100_v8 }
  0x46   :  { %1821 = vmatprep.subr.mxu0 %v2192_v1  ;;  %1832 = vmatprep.subr.mxu1 %v2192_v1  ;;  %p2141_p1 = pnand %p2140_p0, %p2134_p11 }
  0x47   :  { %v589_v15 = vrot.slane %v581_v10, %v2265_v7  ;;  %v582_v16 = vcombine.high %v581_v10, %v581_v10 }
  0x49   :  { %v600_v18 = vrot.slane %v589_v15, %v2272_v11  ;;  %v596_v19 = vrot.slane %v582_v16, %v2265_v7  ;;  %1822 = vmatpush3.xpose.msk.msra.mxu0 %vm110_vm1, %v99_v13  ;;  %1833 = vmatpush3.xpose.msk.msra.mxu1 %vm110_vm1, %v99_v13 }
  0x4a   :  { %1823 = vmatprep.subr.mxu0 %v2192_v1  ;;  %1834 = vmatprep.subr.mxu1 %v2192_v1 }
  0x4b   :  { %v607_v22 = vmul.f32 %v600_v18, %v573_v14  ;;  %v604_v23 = vrot.slane %v596_v19, %v2272_v11 }
  0x4d   :  { %v609_v24 = vsel %vm110_vm1, %v607_v22, 0.0  ;;  %1824 = vmatpush3.xpose.msk.msra.mxu0 %vm110_vm1, %v98_v21  ;;  %1835 = vmatpush3.xpose.msk.msra.mxu1 %vm110_vm1, %v98_v21  ;;  %v608_v25 = vmul.f32 %v604_v23, %v574_v20 }
  0x4e   :  { %1839 = vmatprep.subr.mxu0 %v2192_v1  ;;  %1850 = vmatprep.subr.mxu1 %v2192_v1 }
  0x4f   :  { %610 = vadd.xlane.f32.xlu0 %v609_v24  ;;  %v612_v27 = vsel %vm110_vm1, %v608_v25, 0.0 }
  0x50   :  { %1826 = vmatmul.mubr.msk.f32.vlgmr.msra.gmra.mxu0 %vm110_vm1, %v2276_v12  ;;  %1837 = vmatmul.mubr.msk.f32.vlgmr.msra.gmra.mxu1 %vm110_vm1, %v2283_v17 }
  0x51   :  { %1840 = vmatpush3.xpose.msk.msra.mxu0 %vm110_vm1, %v109_v26  ;;  %1851 = vmatpush3.xpose.msk.msra.mxu1 %vm110_vm1, %v109_v26 }
  0x52   :  { %1841 = vmatprep.subr.mxu0 %v2192_v1  ;;  %1852 = vmatprep.subr.mxu1 %v2192_v1 }
  0x53   :  { %1847 = vmatprep.mubr.msk.f32.mxu0 %vm2193_vm0, %v2192_v1  ;;  %1858 = vmatprep.mubr.msk.f32.mxu1 %vm2193_vm0, %v2192_v1 }
  0x54   :  { %613 = vadd.xlane.f32.xlu0 %v612_v27 }
  0x55   :  { %1842 = vmatpush3.xpose.msk.msra.mxu0 %vm110_vm1, %v108_v28  ;;  %1853 = vmatpush3.xpose.msk.msra.mxu1 %vm110_vm1, %v108_v28 }
  0x56   :  { %1843 = vmatprep.subr.mxu0 %v2192_v1  ;;  %1854 = vmatprep.subr.mxu1 %v2192_v1 }
  0x59   :  { %1844 = vmatpush3.xpose.msk.msra.mxu0 %vm110_vm1, %v107_v29  ;;  %1855 = vmatpush3.xpose.msk.msra.mxu1 %vm110_vm1, %v107_v29 }
  0x5a   :  { %1845 = vmatprep.subr.mxu0 %v2192_v1  ;;  %1856 = vmatprep.subr.mxu1 %v2192_v1 }
  0x5d   :  { %1846 = vmatpush3.xpose.msk.msra.mxu0 %vm110_vm1, %v106_v30  ;;  %1857 = vmatpush3.xpose.msk.msra.mxu1 %vm110_vm1, %v106_v30 }
  0x5e   :  { %1861 = vmatprep.subr.mxu0 %v2192_v1  ;;  %1872 = vmatprep.subr.mxu1 %v2192_v1 }
  0x60   :  { %1848 = vmatmul.mubr.msk.f32.vlgmr.msra.gmra.mxu0 %vm110_vm1, %v94_v9  ;;  %1859 = vmatmul.mubr.msk.f32.vlgmr.msra.gmra.mxu1 %vm110_vm1, %v2322_v31 }
  0x61   :  { %1862 = vmatpush3.xpose.msk.msra.mxu0 %vm110_vm1, %v109_v26  ;;  %1873 = vmatpush3.xpose.msk.msra.mxu1 %vm110_vm1, %v109_v26 }
  0x62   :  { %1863 = vmatprep.subr.mxu0 %v2192_v1  ;;  %1874 = vmatprep.subr.mxu1 %v2192_v1 }
  0x63   :  { %1869 = vmatprep.mubr.msk.f32.mxu0 %vm2193_vm0, %v2192_v1  ;;  %1880 = vmatprep.mubr.msk.f32.mxu1 %vm2193_vm0, %v2192_v1 }
  0x65   :  { %1864 = vmatpush3.xpose.msk.msra.mxu0 %vm110_vm1, %v108_v28  ;;  %1875 = vmatpush3.xpose.msk.msra.mxu1 %vm110_vm1, %v108_v28 }
  0x66   :  { %1865 = vmatprep.subr.mxu0 %v2192_v1  ;;  %1876 = vmatprep.subr.mxu1 %v2192_v1 }
  0x69   :  { %1866 = vmatpush3.xpose.msk.msra.mxu0 %vm110_vm1, %v107_v29  ;;  %1877 = vmatpush3.xpose.msk.msra.mxu1 %vm110_vm1, %v107_v29  ;;  %v842_v29 = vrot.slane %v2322_v31, %v2265_v7 }
  0x6a   :  { %1867 = vmatprep.subr.mxu0 %v2192_v1  ;;  %1878 = vmatprep.subr.mxu1 %v2192_v1 }
  0x6d   :  { %1868 = vmatpush3.xpose.msk.msra.mxu0 %vm110_vm1, %v106_v30  ;;  %1879 = vmatpush3.xpose.msk.msra.mxu1 %vm110_vm1, %v106_v30  ;;  %v850_v30 = vrot.slane %v842_v29, %v2265_v7 }
  0x6e   :  { %1883 = vmatprep.subr.mxu0 %v2192_v1  ;;  %1894 = vmatprep.subr.mxu1 %v2192_v1 }
  0x70   :  { %1870 = vmatmul.mubr.msk.f32.vlgmr.msra.gmra.mxu0 %vm110_vm1, %v2347_v32  ;;  %1881 = vmatmul.mubr.msk.f32.vlgmr.msra.gmra.mxu1 %vm110_vm1, %v2349_v33 }
  0x71   :  { %1884 = vmatpush3.xpose.msk.msra.mxu0 %vm110_vm1, %v2353_v34  ;;  %1895 = vmatpush3.xpose.msk.msra.mxu1 %vm110_vm1, %v2353_v34 }
  0x72   :  { %1885 = vmatprep.subr.mxu0 %v2192_v1  ;;  %1896 = vmatprep.subr.mxu1 %v2192_v1 }
  0x73   :  { %1891 = vmatprep.mubr.msk.f32.mxu0 %vm2193_vm0, %v2192_v1  ;;  %1902 = vmatprep.mubr.msk.f32.mxu1 %vm2193_vm0, %v2192_v1 }
  0x75   :  { %1886 = vmatpush3.xpose.msk.msra.mxu0 %vm110_vm1, %v2365_v35  ;;  %1897 = vmatpush3.xpose.msk.msra.mxu1 %vm110_vm1, %v2365_v35 }
  0x76   :  { %1887 = vmatprep.subr.mxu0 %v2192_v1  ;;  %1898 = vmatprep.subr.mxu1 %v2192_v1 }
  0x79   :  { %1888 = vmatpush3.xpose.msk.msra.mxu0 %vm110_vm1, %v2377_v36  ;;  %1899 = vmatpush3.xpose.msk.msra.mxu1 %vm110_vm1, %v2377_v36 }
  0x7a   :  { %1889 = vmatprep.subr.mxu0 %v2192_v1  ;;  %1900 = vmatprep.subr.mxu1 %v2192_v1 }
  0x7d   :  { %1890 = vmatpush3.xpose.msk.msra.mxu0 %vm110_vm1, %v2385_v37  ;;  %1901 = vmatpush3.xpose.msk.msra.mxu1 %vm110_vm1, %v2385_v37 }
  0x7e   :  { %1905 = vmatprep.subr.mxu0 %v2192_v1  ;;  %1916 = vmatprep.subr.mxu1 %v2192_v1 }
  0x80   :  { %1892 = vmatmul.mubr.msk.f32.vlgmr.msra.gmra.mxu0 %vm110_vm1, %v2276_v12  ;;  %1903 = vmatmul.mubr.msk.f32.vlgmr.msra.gmra.mxu1 %vm110_vm1, %v2283_v17 }
  0x81   :  { %1906 = vmatpush3.xpose.msk.msra.mxu0 %vm110_vm1, %v2353_v34  ;;  %1917 = vmatpush3.xpose.msk.msra.mxu1 %vm110_vm1, %v2353_v34 }
  0x82   :  { %1907 = vmatprep.subr.mxu0 %v2192_v1  ;;  %1918 = vmatprep.subr.mxu1 %v2192_v1 }
  0x83   :  { %1913 = vmatprep.mubr.msk.f32.mxu0 %vm2193_vm0, %v2192_v1  ;;  %1924 = vmatprep.mubr.msk.f32.mxu1 %vm2193_vm0, %v2192_v1 }
  0x85   :  { %1908 = vmatpush3.xpose.msk.msra.mxu0 %vm110_vm1, %v2365_v35  ;;  %1919 = vmatpush3.xpose.msk.msra.mxu1 %vm110_vm1, %v2365_v35 }
  0x86   :  { %1909 = vmatprep.subr.mxu0 %v2192_v1  ;;  %1920 = vmatprep.subr.mxu1 %v2192_v1 }
  0x89   :  { %1910 = vmatpush3.xpose.msk.msra.mxu0 %vm110_vm1, %v2377_v36  ;;  %1921 = vmatpush3.xpose.msk.msra.mxu1 %vm110_vm1, %v2377_v36 }
  0x8a   :  { %1911 = vmatprep.subr.mxu0 %v2192_v1  ;;  %1922 = vmatprep.subr.mxu1 %v2192_v1 }
  0x8d   :  { %1912 = vmatpush3.xpose.msk.msra.mxu0 %vm110_vm1, %v2385_v37  ;;  %1923 = vmatpush3.xpose.msk.msra.mxu1 %vm110_vm1, %v2385_v37 }
  0x8e   :  { %1927 = vmatprep.subr.mxu0 %v2192_v1  ;;  %1938 = vmatprep.subr.mxu1 %v2192_v1 }
  0xd8   :  { %v611_v38 = vpop.xlane.xlu0 %610 }
  0xd9   :  { %v1699_v44 = vmul.f32 -1.442695, %v611_v38  ;;  %v843_v38 = vcombine.high %v842_v29, %v842_v29 }
  0xdb   :  { %1985 = vpow2.f32 %v1699_v44  ;;  %v857_v44 = vrot.slane %v843_v38, %v2265_v7 }
  0xdd   :  { %v614_v43 = vpop.xlane.xlu0 %613 }
  0xde   :  { %v1700_v45 = vmul.f32 -1.442695, %v614_v43  ;;  %v861_v43 = vrot.slane %v850_v30, %v2272_v11 }
  0xe0   :  { %1987 = vpow2.f32 %v1700_v45 }
  0xe8   :  { %v1986_v50 = vpop.eup %1985 }
  0xe9   :  { %v621_v52 = vadd.f32 1.0, %v1986_v50  ;;  %v865_v50 = vrot.slane %v857_v44, %v2272_v11 }
  0xeb   :  { %1989 = vrcp.f32 %v621_v52 }
  0xed   :  { %v1988_v51 = vpop.eup %1987 }
  0xee   :  { %v622_v53 = vadd.f32 1.0, %v1988_v51 }
  0xf0   :  { %1991 = vrcp.f32 %v622_v53 }
  0xf8   :  { %v1990_v60 = vpop.eup %1989 }
  0xf9   :  { %v816_v0 = vsub.f32 1.0, %v1990_v60 }
  0xfb   :  { %v818_v15 = vmul.f32 %v816_v0, %v2276_v12 }
  0xfd   :  { %v1992_v61 = vpop.eup %1991 }
  0xfe   :  { %v817_v2 = vsub.f32 1.0, %v1992_v61 }
 0x100   :  { %v819_v18 = vmul.f32 %v817_v2, %v2283_v17 }
 0x110   :  { %v2425_v39 = vpop.f32.mrf.mxu0  ;;  %v2427_v40 = vpop.f32.mrf.mxu1 }
 0x112   :  { %v1827_v41 = vpop.f32.mrf.mxu0  ;;  %v1838_v42 = vpop.f32.mrf.mxu1 }
 0x120   :  { %v350_v46 = vpop.f32.mrf.mxu0  ;;  %v2429_v47 = vpop.f32.mrf.mxu1 }
 0x121   :  { %v786_v58 = vrot.slane %v350_v46, %v2265_v7 }
 0x122   :  { %v1849_v48 = vpop.f32.mrf.mxu0  ;;  %v1860_v49 = vpop.f32.mrf.mxu1 }
 0x123   :  { %v787_v59 = vcombine.high %v786_v58, %v786_v58  ;;  %v794_v62 = vrot.slane %v786_v58, %v2265_v7 }
 0x125   :  { %v801_v63 = vrot.slane %v787_v59, %v2265_v7  ;;  %v805_v6 = vrot.slane %v794_v62, %v2272_v11 }
 0x127   :  { %v809_v9 = vrot.slane %v801_v63, %v2272_v11 }
 0x130   :  { %v2431_v54 = vpop.f32.mrf.mxu0  ;;  %v2433_v55 = vpop.f32.mrf.mxu1 }
 0x132   :  { %v1871_v56 = vpop.f32.mrf.mxu0  ;;  %v1882_v57 = vpop.f32.mrf.mxu1 }
 0x133   :  { %v1045_v56 = vrot.slane %v2429_v47, %v2265_v7 }
 0x135   :  { %v1046_v57 = vcombine.high %v1045_v56, %v1045_v56  ;;  %v1053_v58 = vrot.slane %v1045_v56, %v2265_v7 }
 0x137   :  { %v1060_v59 = vrot.slane %v1046_v57, %v2265_v7  ;;  %v1304_v57 = vrot.slane %v2431_v54, %v2265_v7 }
 0x140   :  { %v705_v3 = vpop.f32.mrf.mxu0  ;;  %v775_v4 = vpop.f32.mrf.mxu1 }
 0x141   :  { %v706_v5 = vadd.f32 %v705_v3, %v2425_v39  ;;  %v776_v8 = vadd.f32 %v775_v4, %v2427_v40  ;;  %v1064_v3 = vrot.slane %v1053_v58, %v2272_v11  ;;  %v1305_v58 = vcombine.high %v1304_v57, %v1304_v57 }
 0x142   :  { %v1893_v10 = vpop.f32.mrf.mxu0  ;;  %v1904_v13 = vpop.f32.mrf.mxu1 }
 0x143   :  { %v812_v14 = vadd.f32 %v805_v6, %v706_v5  ;;  %v813_v16 = vadd.f32 %v809_v9, %v776_v8  ;;  %v1068_v6 = vrot.slane %v1060_v59, %v2272_v11  ;;  %v1312_v59 = vrot.slane %v1304_v57, %v2265_v7 }
 0x145   :  { %v814_v19 = vmul.f32 %v1990_v60, %v812_v14  ;;  %v815_v20 = vmul.f32 %v1992_v61, %v813_v16 }
 0x147   :  { %v820_v21 = vadd.f32 %v818_v15, %v814_v19  ;;  %v821_v22 = vadd.f32 %v819_v18, %v815_v20 }
 0x149   :  { %1914 = vmatmul.mubr.msk.f32.vlgmr.msra.gmra.mxu0 %vm110_vm1, %v820_v21  ;;  %1925 = vmatmul.mubr.msk.f32.vlgmr.msra.gmra.mxu1 %vm110_vm1, %v821_v22  ;;  %v822_v23 = vmul.f32 %v820_v21, %v820_v21  ;;  %v823_v25 = vmul.f32 %v821_v22, %v821_v22 }
 0x14a   :  { %1928 = vmatpush3.xpose.msk.msra.mxu0 %vm110_vm1, %v2353_v34  ;;  %1939 = vmatpush3.xpose.msk.msra.mxu1 %vm110_vm1, %v2353_v34 }
 0x14b   :  { %v824_v24 = vsel %vm110_vm1, %v822_v23, 0.0  ;;  %1929 = vmatprep.subr.mxu0 %v2192_v1  ;;  %1940 = vmatprep.subr.mxu1 %v2192_v1  ;;  %v827_v26 = vsel %vm110_vm1, %v823_v25, 0.0 }
 0x14c   :  { %825 = vadd.xlane.f32.xlu1 %v824_v24  ;;  %1935 = vmatprep.mubr.msk.f32.mxu0 %vm2193_vm0, %v2192_v1 }
 0x14d   :  { %1946 = vmatprep.mubr.msk.f32.mxu1 %vm2193_vm0, %v2192_v1 }
 0x14e   :  { %1930 = vmatpush3.xpose.msk.msra.mxu0 %vm110_vm1, %v2365_v35  ;;  %1941 = vmatpush3.xpose.msk.msra.mxu1 %vm110_vm1, %v2365_v35 }
 0x14f   :  { %1931 = vmatprep.subr.mxu0 %v2192_v1  ;;  %1942 = vmatprep.subr.mxu1 %v2192_v1 }
 0x150   :  { %828 = vadd.xlane.f32.xlu1 %v827_v26 }
 0x152   :  { %1932 = vmatpush3.xpose.msk.msra.mxu0 %vm110_vm1, %v2377_v36  ;;  %1943 = vmatpush3.xpose.msk.msra.mxu1 %vm110_vm1, %v2377_v36 }
 0x153   :  { %1933 = vmatprep.subr.mxu0 %v2192_v1  ;;  %1944 = vmatprep.subr.mxu1 %v2192_v1 }
 0x156   :  { %1934 = vmatpush3.xpose.msk.msra.mxu0 %vm110_vm1, %v2385_v37  ;;  %1945 = vmatpush3.xpose.msk.msra.mxu1 %vm110_vm1, %v2385_v37 }
 0x157   :  { %1949 = vmatprep.subr.mxu0 %v2192_v1  ;;  %1960 = vmatprep.subr.mxu1 %v2192_v1 }
 0x1d5   :  { %v826_v27 = vpop.xlane.xlu1 %825 }
 0x1d6   :  { %1993 = vrsqrt.f32 %v826_v27 }
 0x1d9   :  { %v829_v28 = vpop.xlane.xlu1 %828 }
 0x1da   :  { %1995 = vrsqrt.f32 %v829_v28 }
 0x1e3   :  { %v1994_v41 = vpop.eup %1993 }
 0x1e4   :  { %v832_v42 = vmul.f32 %v1994_v41, %v820_v21 }
 0x1e6   :  { %v834_v45 = vadd.f32 %v832_v42, %v2276_v12 }
 0x1e7   :  { %v1996_v46 = vpop.eup %1995 }
 0x1e8   :  { %v868_v48 = vmul.f32 %v861_v43, %v834_v45  ;;  %v833_v49 = vmul.f32 %v1996_v46, %v821_v22 }
 0x1ea   :  { %v870_v51 = vsel %vm110_vm1, %v868_v48, 0.0  ;;  %v835_v31 = vadd.f32 %v833_v49, %v2283_v17 }
 0x1eb   :  { %871 = vadd.xlane.f32.xlu0 %v870_v51 }
 0x1ec   :  { %v869_v52 = vmul.f32 %v865_v50, %v835_v31 }
 0x1ee   :  { %v873_v53 = vsel %vm110_vm1, %v869_v52, 0.0 }
 0x1ef   :  { %874 = vadd.xlane.f32.xlu1 %v873_v53 }
 0x209   :  { %v957_v60 = vpop.f32.mrf.mxu0  ;;  %v1030_v61 = vpop.f32.mrf.mxu1 }
 0x20a   :  { %v1034_v62 = vmul.f32 %v1994_v41, %v957_v60  ;;  %v1035_v63 = vmul.f32 %v1996_v46, %v1030_v61 }
 0x20b   :  { %v1915_v0 = vpop.f32.mrf.mxu0  ;;  %v1926_v2 = vpop.f32.mrf.mxu1 }
 0x20c   :  { %v1036_v4 = vadd.f32 %v1034_v62, %v2425_v39  ;;  %v1037_v5 = vadd.f32 %v1035_v63, %v2427_v40  ;;  %v1319_v63 = vrot.slane %v1305_v58, %v2265_v7  ;;  %v1323_v0 = vrot.slane %v1312_v59, %v2272_v11 }
 0x20e   :  { %v1071_v47 = vadd.f32 %v1064_v3, %v1036_v4  ;;  %v1072_v8 = vadd.f32 %v1068_v6, %v1037_v5  ;;  %v1327_v54 = vrot.slane %v1319_v63, %v2272_v11 }
 0x274   :  { %v872_v9 = vpop.xlane.xlu0 %871 }
 0x275   :  { %v1711_v10 = vmul.f32 -1.442695, %v872_v9 }
 0x277   :  { %1997 = vpow2.f32 %v1711_v10 }
 0x278   :  { %v875_v13 = vpop.xlane.xlu1 %874 }
 0x279   :  { %v1712_v14 = vmul.f32 -1.442695, %v875_v13 }
 0x27b   :  { %1999 = vpow2.f32 %v1712_v14 }
 0x284   :  { %v1998_v15 = vpop.eup %1997 }
 0x285   :  { %v882_v16 = vadd.f32 1.0, %v1998_v15 }
 0x287   :  { %2001 = vrcp.f32 %v882_v16 }
 0x288   :  { %v2000_v18 = vpop.eup %1999 }
 0x289   :  { %v883_v19 = vadd.f32 1.0, %v2000_v18 }
 0x28b   :  { %2003 = vrcp.f32 %v883_v19 }
 0x294   :  { %v2002_v20 = vpop.eup %2001 }
 0x295   :  { %v1075_v21 = vsub.f32 1.0, %v2002_v20  ;;  %v1073_v22 = vmul.f32 %v2002_v20, %v1071_v47 }
 0x297   :  { %v1077_v23 = vmul.f32 %v1075_v21, %v832_v42 }
 0x298   :  { %v2004_v24 = vpop.eup %2003 }
 0x299   :  { %v1079_v25 = vadd.f32 %v1077_v23, %v1073_v22  ;;  %v1076_v26 = vsub.f32 1.0, %v2004_v24  ;;  %v1074_v28 = vmul.f32 %v2004_v24, %v1072_v8 }
 0x29b   :  { %1936 = vmatmul.mubr.msk.f32.vlgmr.msra.gmra.mxu0 %vm110_vm1, %v1079_v25  ;;  %v1081_v27 = vmul.f32 %v1079_v25, %v1079_v25  ;;  %v1078_v29 = vmul.f32 %v1076_v26, %v833_v49 }
 0x29c   :  { %1950 = vmatpush3.xpose.msk.msra.mxu0 %vm110_vm1, %v2353_v34  ;;  %1957 = vmatprep.mubr.msk.f32.mxu0 %vm2193_vm0, %v2192_v1 }
 0x29d   :  { %v1083_v30 = vsel %vm110_vm1, %v1081_v27, 0.0  ;;  %v1080_v38 = vadd.f32 %v1078_v29, %v1074_v28  ;;  %1951 = vmatprep.subr.mxu0 %v2192_v1 }
 0x29e   :  { %1084 = vadd.xlane.f32.xlu0 %v1083_v30 }
 0x29f   :  { %1947 = vmatmul.mubr.msk.f32.vlgmr.msra.gmra.mxu1 %vm110_vm1, %v1080_v38  ;;  %v1082_v41 = vmul.f32 %v1080_v38, %v1080_v38 }
 0x2a0   :  { %1952 = vmatpush3.xpose.msk.msra.mxu0 %vm110_vm1, %v2365_v35  ;;  %1961 = vmatpush3.xpose.msk.msra.mxu1 %vm110_vm1, %v2353_v34 }
 0x2a1   :  { %v1086_v42 = vsel %vm110_vm1, %v1082_v41, 0.0  ;;  %1953 = vmatprep.subr.mxu0 %v2192_v1  ;;  %1962 = vmatprep.subr.mxu1 %v2192_v1 }
 0x2a2   :  { %1087 = vadd.xlane.f32.xlu1 %v1086_v42  ;;  %1968 = vmatprep.mubr.msk.f32.mxu1 %vm2193_vm0, %v2192_v1 }
 0x2a4   :  { %1954 = vmatpush3.xpose.msk.msra.mxu0 %vm110_vm1, %v2377_v36  ;;  %1963 = vmatpush3.xpose.msk.msra.mxu1 %vm110_vm1, %v2365_v35  ;;  %v1101_v35 = vrot.slane %v2347_v32, %v2265_v7 }
 0x2a5   :  { %1955 = vmatprep.subr.mxu0 %v2192_v1  ;;  %1964 = vmatprep.subr.mxu1 %v2192_v1 }
 0x2a6   :  { %v1109_v44 = vrot.slane %v1101_v35, %v2265_v7  ;;  %v1102_v45 = vcombine.high %v1101_v35, %v1101_v35  ;;  %v1360_v35 = vrot.slane %v2349_v33, %v2265_v7 }
 0x2a8   :  { %1956 = vmatpush3.xpose.msk.msra.mxu0 %vm110_vm1, %v2385_v37  ;;  %1965 = vmatpush3.xpose.msk.msra.mxu1 %vm110_vm1, %v2377_v36  ;;  %v1120_v49 = vrot.slane %v1109_v44, %v2272_v11  ;;  %v1116_v36 = vrot.slane %v1102_v45, %v2265_v7  ;;  %v1368_v44 = vrot.slane %v1360_v35, %v2265_v7 }
 0x2a9   :  { %1966 = vmatprep.subr.mxu1 %v2192_v1  ;;  %v1361_v45 = vcombine.high %v1360_v35, %v1360_v35 }
 0x2aa   :  { %v1124_v31 = vrot.slane %v1116_v36, %v2272_v11 }
 0x2ab   :  { %v1375_v36 = vrot.slane %v1361_v45, %v2265_v7 }
 0x2ac   :  { %1967 = vmatpush3.xpose.msk.msra.mxu1 %vm110_vm1, %v2385_v37 }
 0x327   :  { %v1085_v34 = vpop.xlane.xlu0 %1084 }
 0x328   :  { %2005 = vrsqrt.f32 %v1085_v34 }
 0x32b   :  { %v1088_v43 = vpop.xlane.xlu1 %1087 }
 0x32c   :  { %2007 = vrsqrt.f32 %v1088_v43 }
 0x335   :  { %v2006_v46 = vpop.eup %2005 }
 0x336   :  { %v1091_v48 = vmul.f32 %v2006_v46, %v1079_v25 }
 0x338   :  { %v1093_v1 = vadd.f32 %v1091_v48, %v2276_v12 }
 0x339   :  { %v2008_v50 = vpop.eup %2007 }
 0x33a   :  { %v1127_v37 = vmul.f32 %v1120_v49, %v1093_v1  ;;  %v1092_v51 = vmul.f32 %v2008_v50, %v1080_v38  ;;  %v1379_v49 = vrot.slane %v1368_v44, %v2272_v11 }
 0x33c   :  { %v1129_v52 = vsel %vm110_vm1, %v1127_v37, 0.0  ;;  %v1094_v32 = vadd.f32 %v1092_v51, %v2283_v17 }
 0x33d   :  { %1130 = vadd.xlane.f32.xlu0 %v1129_v52 }
 0x33e   :  { %v1128_v53 = vmul.f32 %v1124_v31, %v1094_v32  ;;  %v1383_v31 = vrot.slane %v1375_v36, %v2272_v11 }
 0x340   :  { %v1132_v56 = vsel %vm110_vm1, %v1128_v53, 0.0 }
 0x341   :  { %1133 = vadd.xlane.f32.xlu1 %v1132_v56  ;;  %v1563_v56 = vrot.slane %v2433_v55, %v2265_v7 }
 0x343   :  { %v1564_v57 = vcombine.high %v1563_v56, %v1563_v56 }
 0x35b   :  { %v1216_v60 = vpop.f32.mrf.mxu0 }
 0x35c   :  { %v1293_v61 = vmul.f32 %v2006_v46, %v1216_v60 }
 0x35d   :  { %v1937_v62 = vpop.f32.mrf.mxu0 }
 0x35e   :  { %v1295_v2 = vadd.f32 %v1293_v61, %v2425_v39  ;;  %v1578_v61 = vrot.slane %v1564_v57, %v2265_v7 }
 0x35f   :  { %v1289_v3 = vpop.f32.mrf.mxu1 }
 0x360   :  { %v1330_v4 = vadd.f32 %v1323_v0, %v1295_v2  ;;  %v1294_v5 = vmul.f32 %v2008_v50, %v1289_v3  ;;  %v1586_v55 = vrot.slane %v1578_v61, %v2272_v11 }
 0x361   :  { %v1948_v6 = vpop.f32.mrf.mxu1 }
 0x362   :  { %v1296_v47 = vadd.f32 %v1294_v5, %v2427_v40 }
 0x364   :  { %v1331_v8 = vadd.f32 %v1327_v54, %v1296_v47 }
 0x3c6   :  { %v1131_v9 = vpop.xlane.xlu0 %1130 }
 0x3c7   :  { %v1723_v10 = vmul.f32 -1.442695, %v1131_v9 }
 0x3c9   :  { %2009 = vpow2.f32 %v1723_v10 }
 0x3ca   :  { %v1134_v13 = vpop.xlane.xlu1 %1133 }
 0x3cb   :  { %v1724_v14 = vmul.f32 -1.442695, %v1134_v13 }
 0x3cd   :  { %2011 = vpow2.f32 %v1724_v14 }
 0x3d6   :  { %v2010_v15 = vpop.eup %2009 }
 0x3d7   :  { %v1141_v16 = vadd.f32 1.0, %v2010_v15 }
 0x3d9   :  { %2013 = vrcp.f32 %v1141_v16 }
 0x3da   :  { %v2012_v18 = vpop.eup %2011 }
 0x3db   :  { %v1142_v19 = vadd.f32 1.0, %v2012_v18 }
 0x3dd   :  { %2015 = vrcp.f32 %v1142_v19 }
 0x3e6   :  { %v2014_v20 = vpop.eup %2013 }
 0x3e7   :  { %v1334_v21 = vsub.f32 1.0, %v2014_v20  ;;  %v1332_v22 = vmul.f32 %v2014_v20, %v1330_v4 }
 0x3e9   :  { %v1336_v23 = vmul.f32 %v1334_v21, %v1091_v48 }
 0x3ea   :  { %v2016_v24 = vpop.eup %2015 }
 0x3eb   :  { %v1338_v25 = vadd.f32 %v1336_v23, %v1332_v22  ;;  %v1335_v26 = vsub.f32 1.0, %v2016_v24  ;;  %v1333_v28 = vmul.f32 %v2016_v24, %v1331_v8 }
 0x3ed   :  { %1958 = vmatmul.mubr.msk.f32.vlgmr.msra.gmra.mxu0 %vm110_vm1, %v1338_v25  ;;  %v1340_v27 = vmul.f32 %v1338_v25, %v1338_v25  ;;  %v1337_v29 = vmul.f32 %v1335_v26, %v1092_v51 }
 0x3ef   :  { %v1342_v30 = vsel %vm110_vm1, %v1340_v27, 0.0  ;;  %v1339_v38 = vadd.f32 %v1337_v29, %v1333_v28 }
 0x3f0   :  { %1343 = vadd.xlane.f32.xlu0 %v1342_v30 }
 0x3f1   :  { %1969 = vmatmul.mubr.msk.f32.vlgmr.msra.gmra.mxu1 %vm110_vm1, %v1339_v38  ;;  %v1341_v41 = vmul.f32 %v1339_v38, %v1339_v38 }
 0x3f3   :  { %v1345_v42 = vsel %vm110_vm1, %v1341_v41, 0.0 }
 0x3f4   :  { %1346 = vadd.xlane.f32.xlu1 %v1345_v42 }
 0x479   :  { %v1344_v34 = vpop.xlane.xlu0 %1343 }
 0x47a   :  { %2017 = vrsqrt.f32 %v1344_v34 }
 0x47d   :  { %v1347_v43 = vpop.xlane.xlu1 %1346 }
 0x47e   :  { %2019 = vrsqrt.f32 %v1347_v43 }
 0x487   :  { %v2018_v46 = vpop.eup %2017 }
 0x488   :  { %v1350_v48 = vmul.f32 %v2018_v46, %v1338_v25 }
 0x48a   :  { %v1352_v1 = vadd.f32 %v1350_v48, %v2276_v12  ;;  %v1571_v12 = vrot.slane %v1563_v56, %v2265_v7 }
 0x48b   :  { %v2020_v50 = vpop.eup %2019 }
 0x48c   :  { %v1386_v37 = vmul.f32 %v1379_v49, %v1352_v1  ;;  %v1351_v51 = vmul.f32 %v2020_v50, %v1339_v38  ;;  %v1582_v62 = vrot.slane %v1571_v12, %v2272_v11 }
 0x48e   :  { %v1388_v52 = vsel %vm110_vm1, %v1386_v37, 0.0  ;;  %v1353_v33 = vadd.f32 %v1351_v51, %v2283_v17 }
 0x48f   :  { %1389 = vadd.xlane.f32.xlu0 %v1388_v52 }
 0x490   :  { %v1387_v32 = vmul.f32 %v1383_v31, %v1353_v33 }
 0x492   :  { %v1391_v53 = vsel %vm110_vm1, %v1387_v32, 0.0 }
 0x493   :  { %1392 = vadd.xlane.f32.xlu1 %v1391_v53 }
 0x4ad   :  { %v1475_v58 = vpop.f32.mrf.mxu0 }
 0x4ae   :  { %v1552_v59 = vmul.f32 %v2018_v46, %v1475_v58 }
 0x4af   :  { %v1959_v60 = vpop.f32.mrf.mxu0 }
 0x4b0   :  { %v1554_v17 = vadd.f32 %v1552_v59, %v2425_v39 }
 0x4b1   :  { %v1548_v63 = vpop.f32.mrf.mxu1 }
 0x4b2   :  { %v1589_v0 = vadd.f32 %v1582_v62, %v1554_v17  ;;  %v1553_v2 = vmul.f32 %v2020_v50, %v1548_v63 }
 0x4b3   :  { %v1970_v3 = vpop.f32.mrf.mxu1 }
 0x4b4   :  { %v1555_v4 = vadd.f32 %v1553_v2, %v2427_v40 }
 0x4b6   :  { %v1590_v5 = vadd.f32 %v1586_v55, %v1555_v4 }
 0x518   :  { %v1390_v6 = vpop.xlane.xlu0 %1389 }
 0x519   :  { %v1735_v47 = vmul.f32 -1.442695, %v1390_v6 }
 0x51b   :  { %2021 = vpow2.f32 %v1735_v47 }
 0x51c   :  { %v1393_v54 = vpop.xlane.xlu1 %1392 }
 0x51d   :  { %v1736_v8 = vmul.f32 -1.442695, %v1393_v54 }
 0x51f   :  { %2023 = vpow2.f32 %v1736_v8 }
 0x528   :  { %v2022_v7 = vpop.eup %2021 }
 0x529   :  { %v1400_v9 = vadd.f32 1.0, %v2022_v7 }
 0x52b   :  { %2025 = vrcp.f32 %v1400_v9 }
 0x52c   :  { %v2024_v10 = vpop.eup %2023 }
 0x52d   :  { %v1401_v39 = vadd.f32 1.0, %v2024_v10 }
 0x52f   :  { %2027 = vrcp.f32 %v1401_v39 }
 0x538   :  { %v2026_v13 = vpop.eup %2025 }
 0x539   :  { %v1593_v14 = vsub.f32 1.0, %v2026_v13  ;;  %v1591_v15 = vmul.f32 %v2026_v13, %v1589_v0 }
 0x53b   :  { %v1595_v16 = vmul.f32 %v1593_v14, %v1350_v48 }
 0x53c   :  { %v2028_v40 = vpop.eup %2027 }
 0x53d   :  { %v1597_v18 = vadd.f32 %v1595_v16, %v1591_v15  ;;  %v1594_v11 = vsub.f32 1.0, %v2028_v40  ;;  %v1592_v20 = vmul.f32 %v2028_v40, %v1590_v5 }
 0x53f   :  { %v1599_v19 = vmul.f32 %v1597_v18, %v1597_v18  ;;  %v1596_v21 = vmul.f32 %v1594_v11, %v1351_v51 }
 0x541   :  { %v1601_v22 = vsel %vm110_vm1, %v1599_v19, 0.0  ;;  %v1598_v23 = vadd.f32 %v1596_v21, %v1592_v20 }
 0x542   :  { %1602 = vadd.xlane.f32.xlu0 %v1601_v22 }
 0x543   :  { %v1600_v24 = vmul.f32 %v1598_v23, %v1598_v23 }
 0x545   :  { %v1604_v25 = vsel %vm110_vm1, %v1600_v24, 0.0 }
 0x546   :  { %1605 = vadd.xlane.f32.xlu1 %v1604_v25 }
 0x5cb   :  { %v1603_v26 = vpop.xlane.xlu0 %1602 }
 0x5cc   :  { %2029 = vrsqrt.f32 %v1603_v26 }
 0x5cf   :  { %v1606_v27 = vpop.xlane.xlu1 %1605 }
 0x5d0   :  { %2031 = vrsqrt.f32 %v1606_v27 }
 0x5d9   :  { %v2030_v28 = vpop.eup %2029 }
 0x5da   :  { %v1609_v29 = vmul.f32 %v2030_v28, %v1597_v18 }
 0x5dc   :  { %v1611_v30 = vmul.f32 %v2026_v13, %v1609_v29  ;;  %1627 = vst.msk [vmem:[#allocation11] sm:$0xff] %vm110_vm1, %v1609_v29 }
 0x5dd   :  { %v2032_v38 = vpop.eup %2031 }
 0x5de   :  { %v1610_v41 = vmul.f32 %v2032_v38, %v1598_v23  ;;  %v1613_v42 = vsel %vm110_vm1, %v1611_v30, 0.0 }
 0x5df   :  { %v1614_v34 = vrot.slane %v1613_v42, 4 }
 0x5e0   :  { %v1612_v43 = vmul.f32 %v2028_v40, %v1610_v41  ;;  %1628 = vst.msk [vmem:[#allocation11 + $0x8] sm:$0xff] %vm110_vm1, %v1610_v41 }
 0x5e1   :  { %2144 = shalt.err (!%p2141_p1)
}
 0x5e2   :  { %1647 = dma.vmem_to_hbm [thread:$0]  %s1642_s4, 256, %s2584_s5, [#allocation4], %s2188_s9, %s2188_s9, %s2189_s10   ;;  %v1615_v35 = vadd.f32 %v1614_v34, %v1613_v42  ;;  %v1620_v44 = vsel %vm110_vm1, %v1612_v43, 0.0  ;;  %vm1631_vm2 = vcmask 1041409   ;;  %vm1634_vm3 = vcmask 254976  }
 0x5e3   :  { %v1621_v45 = vrot.slane %v1620_v44, 4  ;;  %s2196_s26 = smov [#allocation12]  }
 0x5e4   :  { %v1616_v46 = vrot.slane %v1615_v35, 2  ;;  %s1654_s27 = sshll.u32 %s2196_s26, 4  ;;  %s1655_s27 = int_to_ptr.vmem [resolvable:$true] %s1654_s27 }
 0x5e5   :  { %v1622_v49 = vadd.f32 %v1621_v45, %v1620_v44  ;;  %s2153_s5 = scalar_lea.vmem %s1655_s27, 32  ;;  %p2158_p3 = scmp.lt.s32.totalorder %s1655_s27, %s1655_s27 }
 0x5e6   :  { %v1617_v48 = vadd.f32 %v1616_v46, %v1615_v35  ;;  %p2154_p2 = scmp.ne.s32.totalorder %s1655_s27, %s2153_s5  ;;  %p2159_p4 = scmp.lt.s32.totalorder %s2153_s5, %s2153_s5 }
 0x5e7   :  { %v1623_v36 = vrot.slane %v1622_v49, 2 }
 0x5e8   :  { %v1618_v1 = vrot.slane %v1617_v48, 1  ;;  %p2160_p5 = por %p2159_p4, %p2158_p3 }
 0x5e9   :  { %v1624_v50 = vadd.f32 %v1623_v36, %v1622_v49 }
 0x5ea   :  { %v1619_v51 = vadd.f32 %v1618_v1, %v1617_v48  ;;  %p2161_p6 = pnand %p2160_p5, %p2154_p2 }
 0x5eb   :  { %v1625_v37 = vrot.slane %v1624_v50, 1 }
 0x5ed   :  { %v1626_v31 = vadd.f32 %v1625_v37, %v1624_v50 }
 0x5ef   :  { %v1632_v52 = vsel %vm1631_vm2, %v1626_v31, %v1619_v51 }
 0x5f0   :  { %1635 = vst.msk [vmem:[#allocation12] sm:$0x3] %vm1634_vm3, %v1632_v52 }
 0x5f1   :  { %2164 = shalt.err (!%p2161_p6)
}
 0x5f2   :  { %1657 = dma.vmem_to_hbm [thread:$0]  %s1655_s27, 32, %s2585_s6, [#allocation13]  }
 0x5f3   :  { %2179 = dma.done.wait [#allocation4], 256  }
 0x5f4   :  { %2180 = vsyncadd [#allocation4], 4294967040 }
 0x5f5   :  { %2181 = dma.done.wait [#allocation13], 32  }
 0x5f6   :  { %2182 = vsyncadd [#allocation13], 4294967264 }
 0x5f7   :  { %1664 = vsyncpa [#allocation3], 1 }
 0x5f8   :  { %1665 = vsyncpa [#allocation6], 1 }
 0x5f9   :  { %1666 = vsyncpa [#allocation9], 1 }
 0x5fa   :  { %1667 = vsyncpa [#allocation4], 1 }
 0x5fb   :  { %1668 = vsyncpa [#allocation13], 1 }

</bundles_post_ra>
